<compile_context>
chip_gen: v6e
topology: v6e:2x2x1
jax: 0.10.0
libtpu: 0.0.40
codegen_flags: <defaults>
</compile_context>

<pallas_src>
import functools

import jax
import jax.numpy as jnp
from jax import lax
from jax.experimental import pallas as pl
from jax.experimental.pallas import tpu as pltpu


_NEG_BIG = -1e30   # finite "-inf" so max/exp never mix infinities


def _round_up(x, m):
    return (x + m - 1) // m * m


def _tpu_config():
    """Per-generation (TM, TN, vmem_limit_bytes|None, two_core)."""
    try:
        kind = jax.devices()[0].device_kind.lower()
    except Exception:
        kind = ""
    if "v7" in kind:
        return 384, 256, 48 * 1024 * 1024, True     # 2x256^2 MXU, 64 MiB VMEM, 2 TCs
    if "v6" in kind:
        return 512, 256, 96 * 1024 * 1024, False    # 2x256^2 MXU, 128 MiB VMEM
    if "v5" in kind:
        return 256, 128, 64 * 1024 * 1024, False    # 4x128^2 MXU, raise 16 MiB default
    return 256, 128, None, False                    # unknown backend: safe defaults


def _fit_vmem(tm, tn, dp, feat_bytes, has_mask, budget):
    """Shrink (tm, tn) until a rough VMEM estimate fits the per-gen budget."""
    if budget is None:
        return tm, tn

    def est(tm_, tn_):
        feats = 2 * (tm_ + tn_) * dp * feat_bytes        # double-buffered anchor+contrast
        maskb = 2 * tm_ * tn_ * 2 if has_mask else 0     # bf16 mask tiles, double-buffered
        score = 3 * tm_ * tn_ * 4                        # s / exp / temporaries (rough)
        small = 2 * tm_ * 128 * 4 + 8 * tm_ * 4 + 2 * (tm_ + tn_) * 4
        return feats + maskb + score + small

    while tm > 128 and est(tm, tn) > budget:
        tm //= 2
    while tn > 128 and est(tm, tn) > budget:
        tn //= 2
    return tm, tn


def _tile_stats(s, pos_raw_f, k, n_cols):
    """Per-tile partials. Interior tiles (no diagonal, no padded columns) skip all
    index-mask construction; boundary tiles build the masks."""
    i = pl.program_id(0)
    tm, tn = s.shape
    r0 = i * tm
    c0 = k * tn
    diag_overlap = jnp.logical_and(r0 < c0 + tn, c0 < r0 + tm)
    has_pad = (c0 + tn) > n_cols
    needs_mask = jnp.logical_or(diag_overlap, has_pad)

    def masked():
        row_g = r0 + lax.broadcasted_iota(jnp.int32, (tm, tn), 0)
        col_g = c0 + lax.broadcasted_iota(jnp.int32, (tm, tn), 1)
        col_valid = col_g < n_cols                        # drop zero-padded contrast cols
        keep = jnp.logical_and(col_valid, row_g != col_g)  # also drop self-contrast
        # Row max over *valid* columns (diagonal included, as in PyTorch).
        tile_max = jnp.max(jnp.where(col_valid, s, _NEG_BIG), axis=1, keepdims=True)
        # Masked-out entries become exp(-1e30 - m) == exactly 0.0 later.
        s_eff = jnp.where(keep, s, _NEG_BIG)
        posf = jnp.where(keep, pos_raw_f, 0.0)
        sp_add = jnp.sum(s * posf, axis=1, keepdims=True)
        cnt_add = jnp.sum(posf, axis=1, keepdims=True)
        return s_eff, tile_max, sp_add, cnt_add

    def fast():
        tile_max = jnp.max(s, axis=1, keepdims=True)
        sp_add = jnp.sum(s * pos_raw_f, axis=1, keepdims=True)
        cnt_add = jnp.sum(pos_raw_f, axis=1, keepdims=True)
        return s, tile_max, sp_add, cnt_add

    return lax.cond(needs_mask, masked, fast)


def _online_update(s_eff, tile_max, sp_add, cnt_add, k, nk, loss_scale,
                   out_ref, m_ref, l_ref, sp_ref, cnt_ref):
    """Streaming (flash-style) log-sum-exp / positive accumulation update."""

    @pl.when(k == 0)
    def _init():
        m_ref[...] = jnp.full(m_ref.shape, _NEG_BIG, jnp.float32)
        l_ref[...] = jnp.zeros(l_ref.shape, jnp.float32)
        sp_ref[...] = jnp.zeros(sp_ref.shape, jnp.float32)
        cnt_ref[...] = jnp.zeros(cnt_ref.shape, jnp.float32)

    m_old = m_ref[...]
    m_new = jnp.maximum(m_old, tile_max)
    alpha = jnp.exp(m_old - m_new)
    p = jnp.exp(s_eff - m_new)                               # masked entries underflow to 0
    l_ref[...] = alpha * l_ref[...] + jnp.sum(p, axis=1, keepdims=True)
    sp_ref[...] = sp_ref[...] + sp_add
    cnt_ref[...] = cnt_ref[...] + cnt_add
    m_ref[...] = m_new

    @pl.when(k == nk - 1)
    def _finish():
        # mean_log_prob_pos_i = sum_pos(adc)/cnt - rowmax - log(sum exp(adc - rowmax))
        cnt_raw = cnt_ref[...]
        # TODO(synk): rows with no positives give NaN in PyTorch; we guard to keep the
        #             padded-row math finite (guarded rows with real data still match torch).
        cnt = jnp.where(cnt_raw > 0.0, cnt_raw, 1.0)
        mlpp = sp_ref[...] / cnt - m_ref[...] - jnp.log(l_ref[...])
        out_ref[...] = jnp.broadcast_to((-loss_scale) * mlpp, out_ref.shape)


def _scores(arow_ref, acol_ref, inv_temp):
    # NT contraction: A @ B^T without a materialized transpose; f32 accumulation.
    s = lax.dot_general(arow_ref[...], acol_ref[...], (((1,), (1,)), ((), ())),
                        preferred_element_type=jnp.float32)
    # Fold 1/temperature into the f32 score tile once (not the k-invariant anchor tile).
    return s * inv_temp


def _supcon_labels_kernel(arow_ref, acol_ref, rid_ref, cid_ref, out_ref,
                          m_ref, l_ref, sp_ref, cnt_ref,
                          *, inv_temp, loss_scale, n_cols):
    k = pl.program_id(1)
    nk = pl.num_programs(1)
    s = _scores(arow_ref, acol_ref, inv_temp)
    same = rid_ref[...] == cid_ref[...]                      # [TM,1] == [1,TN] -> [TM,TN]
    pos_raw = same.astype(jnp.float32)
    s_eff, tmax, sp_add, cnt_add = _tile_stats(s, pos_raw, k, n_cols)
    _online_update(s_eff, tmax, sp_add, cnt_add, k, nk, loss_scale,
                   out_ref, m_ref, l_ref, sp_ref, cnt_ref)


def _supcon_mask_kernel(arow_ref, acol_ref, mask_ref, out_ref,
                        m_ref, l_ref, sp_ref, cnt_ref,
                        *, inv_temp, loss_scale, n_cols):
    k = pl.program_id(1)
    nk = pl.num_programs(1)
    s = _scores(arow_ref, acol_ref, inv_temp)
    # User mask may be asymmetric / non-binary: use it as weights, like torch does.
    pos_raw = mask_ref[...].astype(jnp.float32)
    s_eff, tmax, sp_add, cnt_add = _tile_stats(s, pos_raw, k, n_cols)
    _online_update(s_eff, tmax, sp_add, cnt_add, k, nk, loss_scale,
                   out_ref, m_ref, l_ref, sp_ref, cnt_ref)


def supcon_loss2(features, labels=None, mask=None, temperature=0.07,
                 contrast_mode='all', base_temperature=0.07,
                 use_bf16_matmul=True):
    """JAX/Pallas forward of SupConLoss2. Returns a scalar float32 loss."""
    features = jnp.asarray(features)
    if features.ndim < 3:
        raise ValueError('[features] needs to be [bsz, n_views, ...], '
                         'at least 3 dimensions are required')
    if labels is not None and mask is not None:
        raise ValueError('Cannot define both [labels] and [mask]')

    bsz, n_views = features.shape[0], features.shape[1]
    # bf16 operands into the MXU (f32 accumulation); f32 MXU is the slow multi-pass mode.
    if features.dtype == jnp.bfloat16 or use_bf16_matmul:
        compute_dtype = jnp.bfloat16
    else:
        compute_dtype = jnp.float32
    feats = features.reshape(bsz, n_views, -1).astype(compute_dtype)
    d = feats.shape[-1]

    # contrast_feature = torch.cat(torch.unbind(features, dim=1), dim=0)  (view-major)
    contrast = jnp.transpose(feats, (1, 0, 2)).reshape(n_views * bsz, d)
    n_contrast = n_views * bsz

    if contrast_mode == 'all':
        anchor = contrast
        n_anchor = n_contrast
    elif contrast_mode == 'one':
        anchor = feats[:, 0, :]
        n_anchor = bsz
    else:
        raise ValueError(f'Unknown mode [{contrast_mode}]')

    dp = _round_up(d, 128)
    feat_bytes = 2 if compute_dtype == jnp.bfloat16 else 4

    tm, tn, vmem_limit, two_core = _tpu_config()
    # Don't pad columns past the next 128 multiple for small problems.
    tn = min(tn, _round_up(n_contrast, 128))
    # v7x has 2 TensorCores: keep the "parallel" row axis >= 2 blocks when possible.
    if two_core:
        while tm > 128 and _round_up(n_anchor, tm) // tm < 2:
            tm //= 2
    # Don't pad rows past the next sublane multiple for small batches.
    tm = max(8, min(tm, _round_up(n_anchor, 8)))
    # Fit the per-generation VMEM budget (esp. v7x's 64 MiB) for large D.
    tm, tn = _fit_vmem(tm, tn, dp, feat_bytes, mask is not None, vmem_limit)

    na_p = _round_up(n_anchor, tm)
    nc_p = _round_up(n_contrast, tn)

    anchor_p = jnp.zeros((na_p, dp), compute_dtype).at[:n_anchor, :d].set(anchor)
    contrast_p = jnp.zeros((nc_p, dp), compute_dtype).at[:n_contrast, :d].set(contrast)

    grid = (na_p // tm, nc_p // tn)
    common = dict(inv_temp=1.0 / float(temperature),
                  loss_scale=float(temperature) / float(base_temperature),
                  n_cols=n_contrast)

    feat_specs = [
        pl.BlockSpec((tm, dp), lambda i, k: (i, 0)),   # anchor row tile (k-invariant)
        pl.BlockSpec((tn, dp), lambda i, k: (k, 0)),   # contrast column tile
    ]

    if mask is None:
        # Labels / SimCLR path: rebuild the positive mask in-kernel from tiny
        # per-item class-id vectors (no N^2 mask traffic over HBM).
        if labels is None:
            base_ids = jnp.arange(bsz, dtype=jnp.int32)        # SimCLR: id == sample index
        else:
            labels = jnp.asarray(labels).reshape(-1)
            if labels.shape[0] != bsz:
                raise ValueError('Num of labels does not match num of features')
            base_ids = labels.astype(jnp.int32)
        col_ids = jnp.tile(base_ids, (n_views,))               # id of each contrast item
        row_ids = col_ids[:n_anchor]                           # anchors are a prefix of contrast order
        col_ids_p = jnp.full((1, nc_p), -1, jnp.int32).at[0, :n_contrast].set(col_ids)
        row_ids_p = jnp.full((na_p, 1), -2, jnp.int32).at[:n_anchor, 0].set(row_ids)

        kernel = functools.partial(_supcon_labels_kernel, **common)
        in_specs = feat_specs + [
            pl.BlockSpec((tm, 1), lambda i, k: (i, 0)),
            pl.BlockSpec((1, tn), lambda i, k: (0, k)),
        ]
        operands = (anchor_p, contrast_p, row_ids_p, col_ids_p)
    else:
        # Arbitrary user mask: tile to [n_anchor, n_contrast], stream bf16 [TM,TN] tiles
        # (halves the dominant HBM stream when D is small), cast to f32 in-kernel.
        mask = jnp.asarray(mask).astype(jnp.float32)
        reps = (n_views, n_views) if contrast_mode == 'all' else (1, n_views)
        big = jnp.tile(mask, reps).astype(jnp.bfloat16)
        big_p = jnp.zeros((na_p, nc_p), jnp.bfloat16).at[:n_anchor, :n_contrast].set(big)

        kernel = functools.partial(_supcon_mask_kernel, **common)
        in_specs = feat_specs + [pl.BlockSpec((tm, tn), lambda i, k: (i, k))]
        operands = (anchor_p, contrast_p, big_p)

    cp_kwargs = dict(dimension_semantics=("parallel", "arbitrary"))
    if vmem_limit is not None:
        cp_kwargs["vmem_limit_bytes"] = vmem_limit

    per_anchor = pl.pallas_call(
        kernel,
        # Lane-dense (128-wide) output block; column 0 holds the per-anchor loss.
        out_shape=jax.ShapeDtypeStruct((na_p, 128), jnp.float32),
        grid=grid,
        in_specs=in_specs,
        out_specs=pl.BlockSpec((tm, 128), lambda i, k: (i, 0)),
        scratch_shapes=[pltpu.VMEM((tm, 1), jnp.float32)] * 4,  # m, l, sum_pos, cnt
        compiler_params=pltpu.CompilerParams(**cp_kwargs),
    )(*operands)

    # loss = loss_1.view(anchor_count, batch_size).mean() == mean over all anchors.
    return jnp.mean(per_anchor[:n_anchor, 0])


def _reference(features, labels=None, mask=None, temperature=0.07,
               contrast_mode='all', base_temperature=0.07):
    """Pure-JAX mirror of the PyTorch forward (for the self-test)."""
    bsz, n_views = features.shape[0], features.shape[1]
    feats = features.reshape(bsz, n_views, -1).astype(jnp.float32)
    if labels is None and mask is None:
        base_mask = jnp.eye(bsz, dtype=jnp.float32)
    elif labels is not None:
        l = jnp.asarray(labels).reshape(-1, 1)
        base_mask = (l == l.T).astype(jnp.float32)
    else:
        base_mask = jnp.asarray(mask).astype(jnp.float32)
    contrast = jnp.transpose(feats, (1, 0, 2)).reshape(n_views * bsz, -1)
    if contrast_mode == 'one':
        anchor = feats[:, 0]
        anchor_count = 1
    else:
        anchor = contrast
        anchor_count = n_views
    adc = (anchor @ contrast.T) / temperature
    logits = adc - jnp.max(adc, axis=1, keepdims=True)
    na, nc = anchor_count * bsz, n_views * bsz
    big_mask = jnp.tile(base_mask, (anchor_count, n_views))
    logits_mask = jnp.ones((na, nc), jnp.float32).at[jnp.arange(na), jnp.arange(na)].set(0.0)
    big_mask = big_mask * logits_mask
    exp_logits = jnp.exp(logits) * logits_mask
    log_prob = logits - jnp.log(exp_logits.sum(1, keepdims=True))
    mlpp = (big_mask * log_prob).sum(1) / big_mask.sum(1)
    return jnp.mean(-(temperature / base_temperature) * mlpp)


if __name__ == "__main__":
    key = jax.random.PRNGKey(0)
    k1, k2 = jax.random.split(key)

    # features: [bsz=8, n_views=2, C=4, S=8]  -> flattened feature dim D=32
    bsz, n_views, C, S = 8, 2, 4, 8
    raw = jax.random.normal(k1, (bsz, n_views, C, S), dtype=jnp.float32)
    flat = raw.reshape(bsz, n_views, -1)
    flat = flat / jnp.linalg.norm(flat, axis=-1, keepdims=True)  # L2-normalized, as in SupCon
    features = flat.reshape(bsz, n_views, C, S)
    labels = jax.random.randint(k2, (bsz,), 0, 3)

    cases = []
    # 1) unsupervised (SimCLR): labels=None, mask=None
    cases.append((jax.block_until_ready(supcon_loss2(features)),
                  _reference(features)))
    # 2) supervised with labels
    cases.append((jax.block_until_ready(supcon_loss2(features, labels=labels)),
                  _reference(features, labels=labels)))
    # 3) explicit contrastive mask
    m = (labels[:, None] == labels[None, :]).astype(jnp.float32)
    cases.append((jax.block_until_ready(supcon_loss2(features, mask=m)),
                  _reference(features, mask=m)))
    # 4) contrast_mode='one'
    cases.append((jax.block_until_ready(supcon_loss2(features, labels=labels,
                                                     contrast_mode='one')),
                  _reference(features, labels=labels, contrast_mode='one')))

    for got, ref in cases:
        assert bool(jnp.isfinite(got)), (got, ref)
        assert bool(jnp.allclose(got, ref, rtol=5e-2, atol=5e-2)), (got, ref)

    print("KERNEL_OK")
</pallas_src>

<mosaic_0001>
module attributes {stable_mosaic.version = 11 : i64} {
  func.func @_supcon_labels_kernel(%arg0: i32, %arg1: i32, %arg2: memref<16x128xbf16, #tpu.memory_space<vmem>>, %arg3: memref<128x128xbf16, #tpu.memory_space<vmem>>, %arg4: memref<16x1xi32, #tpu.memory_space<vmem>>, %arg5: memref<1x128xi32, #tpu.memory_space<vmem>>, %arg6: memref<16x128xf32, #tpu.memory_space<vmem>>, %arg7: memref<16x1xf32, #tpu.memory_space<vmem>>, %arg8: memref<16x1xf32, #tpu.memory_space<vmem>>, %arg9: memref<16x1xf32, #tpu.memory_space<vmem>>, %arg10: memref<16x1xf32, #tpu.memory_space<vmem>>) attributes {dimension_semantics = [#tpu.dimension_semantics<parallel>, #tpu.dimension_semantics<arbitrary>], iteration_bounds = array<i64: 1, 1>, scalar_prefetch = 0 : i64, scratch_operands = 4 : i64, tpu.core_type = #tpu.core_type<tc>, window_params = [{transform_indices = @transform_0, window_bounds = array<i64: 16, 128>}, {transform_indices = @transform_1, window_bounds = array<i64: 128, 128>}, {transform_indices = @transform_2, window_bounds = array<i64: 16, 1>}, {transform_indices = @transform_3, window_bounds = array<i64: 1, 128>}, {transform_indices = @transform_4, window_bounds = array<i64: 16, 128>}]} {
    %c0 = arith.constant 0 : index
    %c0_0 = arith.constant 0 : index
    %0 = vector.load %arg2[%c0, %c0_0] : memref<16x128xbf16, #tpu.memory_space<vmem>>, vector<16x128xbf16>
    %c0_1 = arith.constant 0 : index
    %c0_2 = arith.constant 0 : index
    %1 = vector.load %arg3[%c0_1, %c0_2] : memref<128x128xbf16, #tpu.memory_space<vmem>>, vector<128x128xbf16>
    %cst = arith.constant dense<0.000000e+00> : vector<16x128xf32>
    %2 = tpu.matmul %0, %1, %cst {dimension_numbers = #tpu.dot_dimension_numbers<[1], [1], [0], [0], [0, 0, 1, 0], [], []>} : vector<16x128xbf16>, vector<128x128xbf16>, vector<16x128xf32> -> vector<16x128xf32>
    %cst_3 = arith.constant 14.2857141 : f32
    %3 = vector.broadcast %cst_3 : f32 to vector<16x128xf32>
    %4 = arith.mulf %2, %3 : vector<16x128xf32>
    %c0_4 = arith.constant 0 : index
    %c0_5 = arith.constant 0 : index
    %5 = vector.load %arg4[%c0_4, %c0_5] : memref<16x1xi32, #tpu.memory_space<vmem>>, vector<16x1xi32>
    %c0_6 = arith.constant 0 : index
    %c0_7 = arith.constant 0 : index
    %6 = vector.load %arg5[%c0_6, %c0_7] : memref<1x128xi32, #tpu.memory_space<vmem>>, vector<1x128xi32>
    %7 = vector.broadcast %5 : vector<16x1xi32> to vector<16x128xi32>
    %8 = vector.broadcast %6 : vector<1x128xi32> to vector<16x128xi32>
    %9 = arith.cmpi eq, %7, %8 : vector<16x128xi32>
    %10 = arith.extui %9 : vector<16x128xi1> to vector<16x128xi32>
    %11 = arith.sitofp %10 : vector<16x128xi32> to vector<16x128xf32>
    %c16_i32 = arith.constant 16 : i32
    %12 = arith.muli %arg0, %c16_i32 : i32
    %c128_i32 = arith.constant 128 : i32
    %13 = arith.muli %arg1, %c128_i32 : i32
    %c128_i32_8 = arith.constant 128 : i32
    %14 = arith.addi %13, %c128_i32_8 : i32
    %15 = arith.cmpi slt, %12, %14 : i32
    %c16_i32_9 = arith.constant 16 : i32
    %16 = arith.addi %12, %c16_i32_9 : i32
    %17 = arith.cmpi slt, %13, %16 : i32
    %18 = arith.andi %15, %17 : i1
    %c128_i32_10 = arith.constant 128 : i32
    %19 = arith.addi %13, %c128_i32_10 : i32
    %c16_i32_11 = arith.constant 16 : i32
    %20 = arith.cmpi sgt, %19, %c16_i32_11 : i32
    %21 = arith.ori %18, %20 : i1
    %22 = arith.extui %21 : i1 to i32
    %c0_i32 = arith.constant 0 : i32
    %23 = arith.cmpi ne, %22, %c0_i32 : i32
    %24:4 = scf.if %23 -> (vector<16x128xf32>, vector<16x1xf32>, vector<16x1xf32>, vector<16x1xf32>) {
      %51 = tpu.iota {dimensions = array<i32: 0>} : vector<16x128xi32>
      %52 = vector.broadcast %12 : i32 to vector<16x128xi32>
      %53 = arith.addi %52, %51 : vector<16x128xi32>
      %54 = tpu.iota {dimensions = array<i32: 1>} : vector<16x128xi32>
      %55 = vector.broadcast %13 : i32 to vector<16x128xi32>
      %56 = arith.addi %55, %54 : vector<16x128xi32>
      %c16_i32_33 = arith.constant 16 : i32
      %57 = vector.broadcast %c16_i32_33 : i32 to vector<16x128xi32>
      %58 = arith.cmpi slt, %56, %57 : vector<16x128xi32>
      %59 = arith.cmpi ne, %53, %56 : vector<16x128xi32>
      %60 = arith.andi %58, %59 : vector<16x128xi1>
      %cst_34 = arith.constant -1.000000e+30 : f32
      %61 = vector.broadcast %cst_34 : f32 to vector<16x128xf32>
      %62 = arith.select %58, %4, %61 : vector<16x128xi1>, vector<16x128xf32>
      %cst_35 = arith.constant dense<0xFF800000> : vector<16xf32>
      %63 = vector.multi_reduction <maximumf>, %62, %cst_35 [1] : vector<16x128xf32> to vector<16xf32>
      %64 = vector.shape_cast %63 : vector<16xf32> to vector<16x1xf32>
      %cst_36 = arith.constant -1.000000e+30 : f32
      %65 = vector.broadcast %cst_36 : f32 to vector<16x128xf32>
      %66 = arith.select %60, %4, %65 : vector<16x128xi1>, vector<16x128xf32>
      %cst_37 = arith.constant 0.000000e+00 : f32
      %67 = vector.broadcast %cst_37 : f32 to vector<16x128xf32>
      %68 = arith.select %60, %11, %67 : vector<16x128xi1>, vector<16x128xf32>
      %69 = arith.mulf %4, %68 : vector<16x128xf32>
      %cst_38 = arith.constant dense<0.000000e+00> : vector<16xf32>
      %70 = vector.multi_reduction <add>, %69, %cst_38 [1] : vector<16x128xf32> to vector<16xf32>
      %71 = vector.shape_cast %70 : vector<16xf32> to vector<16x1xf32>
      %cst_39 = arith.constant dense<0.000000e+00> : vector<16xf32>
      %72 = vector.multi_reduction <add>, %68, %cst_39 [1] : vector<16x128xf32> to vector<16xf32>
      %73 = vector.shape_cast %72 : vector<16xf32> to vector<16x1xf32>
      scf.yield %66, %64, %71, %73 : vector<16x128xf32>, vector<16x1xf32>, vector<16x1xf32>, vector<16x1xf32>
    } else {
      %cst_33 = arith.constant dense<0xFF800000> : vector<16xf32>
      %51 = vector.multi_reduction <maximumf>, %4, %cst_33 [1] : vector<16x128xf32> to vector<16xf32>
      %52 = vector.shape_cast %51 : vector<16xf32> to vector<16x1xf32>
      %53 = arith.mulf %4, %11 : vector<16x128xf32>
      %cst_34 = arith.constant dense<0.000000e+00> : vector<16xf32>
      %54 = vector.multi_reduction <add>, %53, %cst_34 [1] : vector<16x128xf32> to vector<16xf32>
      %55 = vector.shape_cast %54 : vector<16xf32> to vector<16x1xf32>
      %cst_35 = arith.constant dense<0.000000e+00> : vector<16xf32>
      %56 = vector.multi_reduction <add>, %11, %cst_35 [1] : vector<16x128xf32> to vector<16xf32>
      %57 = vector.shape_cast %56 : vector<16xf32> to vector<16x1xf32>
      scf.yield %4, %52, %55, %57 : vector<16x128xf32>, vector<16x1xf32>, vector<16x1xf32>, vector<16x1xf32>
    }
    %c0_i32_12 = arith.constant 0 : i32
    %25 = arith.cmpi eq, %arg1, %c0_i32_12 : i32
    %26 = arith.extui %25 : i1 to i32
    %c0_i32_13 = arith.constant 0 : i32
    %27 = arith.cmpi ne, %26, %c0_i32_13 : i32
    scf.if %27 {
      %cst_33 = arith.constant -1.000000e+30 : f32
      %51 = vector.broadcast %cst_33 : f32 to vector<16x1xf32>
      %c0_34 = arith.constant 0 : index
      %c0_35 = arith.constant 0 : index
      %52 = vector.load %arg7[%c0_34, %c0_35] : memref<16x1xf32, #tpu.memory_space<vmem>>, vector<16x1xf32>
      tpu.vector_store %arg7[%c0_34, %c0_35], %51 {strides = array<i32>} : memref<16x1xf32, #tpu.memory_space<vmem>>, vector<16x1xf32>,
      %cst_36 = arith.constant 0.000000e+00 : f32
      %53 = vector.broadcast %cst_36 : f32 to vector<16x1xf32>
      %c0_37 = arith.constant 0 : index
      %c0_38 = arith.constant 0 : index
      %54 = vector.load %arg8[%c0_37, %c0_38] : memref<16x1xf32, #tpu.memory_space<vmem>>, vector<16x1xf32>
      tpu.vector_store %arg8[%c0_37, %c0_38], %53 {strides = array<i32>} : memref<16x1xf32, #tpu.memory_space<vmem>>, vector<16x1xf32>,
      %cst_39 = arith.constant 0.000000e+00 : f32
      %55 = vector.broadcast %cst_39 : f32 to vector<16x1xf32>
      %c0_40 = arith.constant 0 : index
      %c0_41 = arith.constant 0 : index
      %56 = vector.load %arg9[%c0_40, %c0_41] : memref<16x1xf32, #tpu.memory_space<vmem>>, vector<16x1xf32>
      tpu.vector_store %arg9[%c0_40, %c0_41], %55 {strides = array<i32>} : memref<16x1xf32, #tpu.memory_space<vmem>>, vector<16x1xf32>,
      %cst_42 = arith.constant 0.000000e+00 : f32
      %57 = vector.broadcast %cst_42 : f32 to vector<16x1xf32>
      %c0_43 = arith.constant 0 : index
      %c0_44 = arith.constant 0 : index
      %58 = vector.load %arg10[%c0_43, %c0_44] : memref<16x1xf32, #tpu.memory_space<vmem>>, vector<16x1xf32>
      tpu.vector_store %arg10[%c0_43, %c0_44], %57 {strides = array<i32>} : memref<16x1xf32, #tpu.memory_space<vmem>>, vector<16x1xf32>,
    } else {
    }
    %c0_14 = arith.constant 0 : index
    %c0_15 = arith.constant 0 : index
    %28 = vector.load %arg7[%c0_14, %c0_15] : memref<16x1xf32, #tpu.memory_space<vmem>>, vector<16x1xf32>
    %29 = arith.maximumf %28, %24#1 : vector<16x1xf32>
    %30 = arith.subf %28, %29 : vector<16x1xf32>
    %31 = math.exp %30 : vector<16x1xf32>
    %32 = vector.broadcast %29 : vector<16x1xf32> to vector<16x128xf32>
    %33 = arith.subf %24#0, %32 : vector<16x128xf32>
    %34 = math.exp %33 : vector<16x128xf32>
    %c0_16 = arith.constant 0 : index
    %c0_17 = arith.constant 0 : index
    %35 = vector.load %arg8[%c0_16, %c0_17] : memref<16x1xf32, #tpu.memory_space<vmem>>, vector<16x1xf32>
    %36 = arith.mulf %31, %35 : vector<16x1xf32>
    %cst_18 = arith.constant dense<0.000000e+00> : vector<16xf32>
    %37 = vector.multi_reduction <add>, %34, %cst_18 [1] : vector<16x128xf32> to vector<16xf32>
    %38 = vector.shape_cast %37 : vector<16xf32> to vector<16x1xf32>
    %39 = arith.addf %36, %38 : vector<16x1xf32>
    %c0_19 = arith.constant 0 : index
    %c0_20 = arith.constant 0 : index
    %40 = vector.load %arg8[%c0_19, %c0_20] : memref<16x1xf32, #tpu.memory_space<vmem>>, vector<16x1xf32>
    tpu.vector_store %arg8[%c0_19, %c0_20], %39 {strides = array<i32>} : memref<16x1xf32, #tpu.memory_space<vmem>>, vector<16x1xf32>,
    %c0_21 = arith.constant 0 : index
    %c0_22 = arith.constant 0 : index
    %41 = vector.load %arg9[%c0_21, %c0_22] : memref<16x1xf32, #tpu.memory_space<vmem>>, vector<16x1xf32>
    %42 = arith.addf %41, %24#2 : vector<16x1xf32>
    %c0_23 = arith.constant 0 : index
    %c0_24 = arith.constant 0 : index
    %43 = vector.load %arg9[%c0_23, %c0_24] : memref<16x1xf32, #tpu.memory_space<vmem>>, vector<16x1xf32>
    tpu.vector_store %arg9[%c0_23, %c0_24], %42 {strides = array<i32>} : memref<16x1xf32, #tpu.memory_space<vmem>>, vector<16x1xf32>,
    %c0_25 = arith.constant 0 : index
    %c0_26 = arith.constant 0 : index
    %44 = vector.load %arg10[%c0_25, %c0_26] : memref<16x1xf32, #tpu.memory_space<vmem>>, vector<16x1xf32>
    %45 = arith.addf %44, %24#3 : vector<16x1xf32>
    %c0_27 = arith.constant 0 : index
    %c0_28 = arith.constant 0 : index
    %46 = vector.load %arg10[%c0_27, %c0_28] : memref<16x1xf32, #tpu.memory_space<vmem>>, vector<16x1xf32>
    tpu.vector_store %arg10[%c0_27, %c0_28], %45 {strides = array<i32>} : memref<16x1xf32, #tpu.memory_space<vmem>>, vector<16x1xf32>,
    %c0_29 = arith.constant 0 : index
    %c0_30 = arith.constant 0 : index
    %47 = vector.load %arg7[%c0_29, %c0_30] : memref<16x1xf32, #tpu.memory_space<vmem>>, vector<16x1xf32>
    tpu.vector_store %arg7[%c0_29, %c0_30], %29 {strides = array<i32>} : memref<16x1xf32, #tpu.memory_space<vmem>>, vector<16x1xf32>,
    %c0_i32_31 = arith.constant 0 : i32
    %48 = arith.cmpi eq, %arg1, %c0_i32_31 : i32
    %49 = arith.extui %48 : i1 to i32
    %c0_i32_32 = arith.constant 0 : i32
    %50 = arith.cmpi ne, %49, %c0_i32_32 : i32
    scf.if %50 {
      %c0_33 = arith.constant 0 : index
      %c0_34 = arith.constant 0 : index
      %51 = vector.load %arg10[%c0_33, %c0_34] : memref<16x1xf32, #tpu.memory_space<vmem>>, vector<16x1xf32>
      %cst_35 = arith.constant 0.000000e+00 : f32
      %52 = vector.broadcast %cst_35 : f32 to vector<16x1xf32>
      %53 = arith.cmpf ogt, %51, %52 : vector<16x1xf32>
      %cst_36 = arith.constant 1.000000e+00 : f32
      %54 = vector.broadcast %cst_36 : f32 to vector<16x1xf32>
      %55 = arith.select %53, %51, %54 : vector<16x1xi1>, vector<16x1xf32>
      %c0_37 = arith.constant 0 : index
      %c0_38 = arith.constant 0 : index
      %56 = vector.load %arg9[%c0_37, %c0_38] : memref<16x1xf32, #tpu.memory_space<vmem>>, vector<16x1xf32>
      %57 = arith.divf %56, %55 : vector<16x1xf32>
      %c0_39 = arith.constant 0 : index
      %c0_40 = arith.constant 0 : index
      %58 = vector.load %arg7[%c0_39, %c0_40] : memref<16x1xf32, #tpu.memory_space<vmem>>, vector<16x1xf32>
      %59 = arith.subf %57, %58 : vector<16x1xf32>
      %c0_41 = arith.constant 0 : index
      %c0_42 = arith.constant 0 : index
      %60 = vector.load %arg8[%c0_41, %c0_42] : memref<16x1xf32, #tpu.memory_space<vmem>>, vector<16x1xf32>
      %61 = math.log %60 : vector<16x1xf32>
      %62 = arith.subf %59, %61 : vector<16x1xf32>
      %cst_43 = arith.constant -1.000000e+00 : f32
      %63 = vector.broadcast %cst_43 : f32 to vector<16x1xf32>
      %64 = arith.mulf %63, %62 : vector<16x1xf32>
      %65 = vector.shape_cast %64 : vector<16x1xf32> to vector<16x1xf32>
      %66 = vector.broadcast %65 : vector<16x1xf32> to vector<16x128xf32>
      %c0_44 = arith.constant 0 : index
      %c0_45 = arith.constant 0 : index
      %67 = vector.load %arg6[%c0_44, %c0_45] : memref<16x128xf32, #tpu.memory_space<vmem>>, vector<16x128xf32>
      tpu.vector_store %arg6[%c0_44, %c0_45], %66 {strides = array<i32>} : memref<16x128xf32, #tpu.memory_space<vmem>>, vector<16x128xf32>,
    } else {
    }
    return
  }
  func.func @transform_0(%arg0: i32, %arg1: i32) -> (i32, i32) {
    %c0_i32 = arith.constant 0 : i32
    %c0_i32_0 = arith.constant 0 : i32
    return %arg0, %c0_i32 : i32, i32
  }
  func.func @transform_1(%arg0: i32, %arg1: i32) -> (i32, i32) {
    %c0_i32 = arith.constant 0 : i32
    %c0_i32_0 = arith.constant 0 : i32
    return %arg1, %c0_i32 : i32, i32
  }
  func.func @transform_2(%arg0: i32, %arg1: i32) -> (i32, i32) {
    %c0_i32 = arith.constant 0 : i32
    %c0_i32_0 = arith.constant 0 : i32
    return %arg0, %c0_i32 : i32, i32
  }
  func.func @transform_3(%arg0: i32, %arg1: i32) -> (i32, i32) {
    %c0_i32 = arith.constant 0 : i32
    %c0_i32_0 = arith.constant 0 : i32
    return %c0_i32, %arg1 : i32, i32
  }
  func.func @transform_4(%arg0: i32, %arg1: i32) -> (i32, i32) {
    %c0_i32 = arith.constant 0 : i32
    %c0_i32_0 = arith.constant 0 : i32
    return %arg0, %c0_i32 : i32, i32
  }
}

</mosaic_0001>

<bundles_post_ra>
// kernel: tpu_custom_call.1
= control target key start
LH: loop header
LB: loop body
LE: loop exit
PB: predicated region body
PF: predicated region fallthrough
CT: control target
= control target key end

     0   :  { %9 = vsyncpa [#allocation7], 0  ;;  %s586_s0 = inlined_call_operand.vmem [shape: bf16[16,128], index: 0, kind: input, shape index: {}]   ;;  %s587_s1 = inlined_call_operand.hbm [shape: bf16[128,128], index: 1, kind: input, shape index: {}]   ;;  %s588_s2 = inlined_call_operand.vmem [shape: s32[16,1], index: 2, kind: input, shape index: {}]   ;;  %s589_s3 = inlined_call_operand.vmem [shape: s32[1,128], index: 3, kind: input, shape index: {}]   ;;  %s590_s4 = inlined_call_operand.hbm [shape: f32[16,128], index: 4, kind: output, shape index: {}]  }
   0x1   :  { %10 = vsyncpa [#allocation8], 0  ;;  %s494_s15 = smov [#allocation6]  }
   0x2   :  { %s18_s16 = sshll.u32 %s494_s15, 4  ;;  %s19_s16 = int_to_ptr.vmem [resolvable:$true] %s18_s16 }
   0x3   :  { %s458_s17 = scalar_lea.vmem %s19_s16, 1024  ;;  %p463_p1 = scmp.lt.s32.totalorder %s19_s16, %s19_s16 }
   0x4   :  { %p459_p0 = scmp.ne.s32.totalorder %s19_s16, %s458_s17  ;;  %p464_p2 = scmp.lt.s32.totalorder %s458_s17, %s458_s17 }
   0x6   :  { %p465_p3 = por %p464_p2, %p463_p1 }
   0x8   :  { %p466_p4 = pnand %p465_p3, %p459_p0 }
   0xa   :  { %469 = shalt.err (!%p466_p4)
}
   0xb   :  { %s495_s18 = smov 64   ;;  %s496_s19 = smov 4  }
   0xc   :  { %24 = dma.hbm_to_vmem [thread:$0]  %s587_s1, 1024, %s19_s16, [#allocation7], %s495_s18, %s495_s18, %s496_s19  }
   0xd   :  { %490 = dma.done.wait [#allocation7], 1024  }
   0xe   :  { %491 = vsyncadd [#allocation7], 4294966272  ;;  %v497_v0 = vmov 0.0   ;;  %vm498_vm0 = vmmov 0   ;;  %v425_v1 = vld [vmem:[#allocation6 + $0x38] sm:$0xff]   ;;  %v426_v2 = vld [vmem:[#allocation6 + $0x30] sm:$0xff]   ;;  %v180_v10 = vlaneseq }
   0xf   :  { %393 = vmatprep.subr.bf16.mxu0 %v497_v0  ;;  %409 = vmatprep.mubr.msk.bf16.mxu0 %vm498_vm0, %v497_v0  ;;  %v427_v3 = vld [vmem:[#allocation6 + $0x28] sm:$0xff]   ;;  %v428_v4 = vld [vmem:[#allocation6 + $0x20] sm:$0xff]   ;;  %v429_v5 = vld [vmem:[#allocation6 + $0x18] sm:$0xff]   ;;  %v499_v14 = vmov 0   ;;  %vm252_vm3 = vcmask 7168  }
  0x10   :  { %394 = vmatpush3.bf16.xpose.msra.mxu0 %v425_v1  ;;  %v430_v6 = vld [vmem:[#allocation6 + $0x10] sm:$0xff]   ;;  %v431_v7 = vld [vmem:[#allocation6 + $0x8] sm:$0xff]   ;;  %v432_v8 = vld [vmem:[#allocation6] sm:$0xff]   ;;  %v187_v11 = vand.u32 127, %v180_v10  ;;  %v181_v12 = vshrl.u32 %v180_v10, 7  ;;  %424 = vset.pattern.permute.xlu0 %v499_v14  ;;  %255 = vst.msk [vmem:[#allocation3] sm:$0xff] %vm252_vm3, %v497_v0 }
  0x11   :  { %395 = vmatprep.subr.bf16.mxu0 %v497_v0  ;;  %v433_v9 = vld [vmem:[%s586_s0] sm:$0xff]   ;;  %423 = vset.pattern.permute.xlu1 %v499_v14  ;;  %v500_v15 = vmov -1e+30   ;;  %256 = vst.msk [vmem:[#allocation3 + $0x8] sm:$0xff] %vm252_vm3, %v497_v0  ;;  %257 = vst.msk [vmem:[#allocation4] sm:$0xff] %vm252_vm3, %v497_v0  ;;  %v149_v33 = vld [vmem:[%s588_s2 + $0x8] sm:$0xff] }
  0x12   :  { %vm191_vm1 = vcmp.ne.s32.totalorder %v181_v12, %v187_v11  ;;  %v182_v13 = vadd.s32 8, %v181_v12  ;;  %253 = vst.msk [vmem:[#allocation2] sm:$0xff] %vm252_vm3, %v500_v15  ;;  %254 = vst.msk [vmem:[#allocation2 + $0x8] sm:$0xff] %vm252_vm3, %v500_v15  ;;  %vm190_vm4 = vcmp.lt.s32.totalorder %v187_v11, 16  ;;  %v148_v24 = vld [vmem:[%s588_s2] sm:$0xff]  ;;  %s501_s2 = smov [#allocation9]  }
  0x13   :  { %258 = vst.msk [vmem:[#allocation4 + $0x8] sm:$0xff] %vm252_vm3, %v497_v0  ;;  %259 = vst.msk [vmem:[#allocation5] sm:$0xff] %vm252_vm3, %v497_v0  ;;  %v381_v34 = vld [vmem:[%s589_s3] ss:$0 sm:$0xff]  ;;  %s360_s3 = sshll.u32 %s501_s2, 4  ;;  %s361_s3 = int_to_ptr.vmem [resolvable:$true] %s360_s3 }
  0x14   :  { %vm192_vm2 = vcmp.ne.s32.totalorder %v182_v13, %v187_v11  ;;  %260 = vst.msk [vmem:[#allocation5 + $0x8] sm:$0xff] %vm252_vm3, %v497_v0  ;;  %vm193_vm6 = vmand %vm190_vm4, %vm191_vm1  ;;  %s470_s28 = scalar_lea.vmem %s361_s3, 256  ;;  %p475_p6 = scmp.lt.s32.totalorder %s361_s3, %s361_s3 }
  0x15   :  { %vm194_vm7 = vmand %vm190_vm4, %vm192_vm2  ;;  %p471_p5 = scmp.ne.s32.totalorder %s361_s3, %s470_s28  ;;  %p476_p7 = scmp.lt.s32.totalorder %s470_s28, %s470_s28 }
  0x17   :  { %v287_v62 = vld [vmem:[#allocation3] sm:$0xff]  ;;  %p477_p8 = por %p476_p7, %p475_p6 }
  0x18   :  { %396 = vmatpush3.bf16.xpose.msra.mxu0 %v426_v2  ;;  %v300_v10 = vld [vmem:[#allocation4] sm:$0xff] }
  0x19   :  { %397 = vmatprep.subr.bf16.mxu0 %v497_v0  ;;  %v261_v25 = vld [vmem:[#allocation2] sm:$0xff]  ;;  %v262_v28 = vld [vmem:[#allocation2 + $0x8] sm:$0xff]  ;;  %p478_p9 = pnand %p477_p8, %p471_p5 }
  0x1a   :  { %v306_v53 = vld [vmem:[#allocation5] sm:$0xff]  ;;  %v301_v14 = vld [vmem:[#allocation4 + $0x8] sm:$0xff] }
  0x1b   :  { %v307_v58 = vld [vmem:[#allocation5 + $0x8] sm:$0xff] }
  0x20   :  { %398 = vmatpush3.bf16.xpose.msra.mxu0 %v427_v3  ;;  %v288_v3 = vld [vmem:[#allocation3 + $0x8] sm:$0xff] }
  0x21   :  { %399 = vmatprep.subr.bf16.mxu0 %v497_v0 }
  0x28   :  { %400 = vmatpush3.bf16.xpose.msra.mxu0 %v428_v4 }
  0x29   :  { %401 = vmatprep.subr.bf16.mxu0 %v497_v0 }
  0x30   :  { %402 = vmatpush3.bf16.xpose.msra.mxu0 %v429_v5 }
  0x31   :  { %403 = vmatprep.subr.bf16.mxu0 %v497_v0 }
  0x38   :  { %404 = vmatpush3.bf16.xpose.msra.mxu0 %v430_v6 }
  0x39   :  { %405 = vmatprep.subr.bf16.mxu0 %v497_v0 }
  0x40   :  { %406 = vmatpush3.bf16.xpose.msra.mxu0 %v431_v7 }
  0x41   :  { %407 = vmatprep.subr.bf16.mxu0 %v497_v0 }
  0x48   :  { %408 = vmatpush3.bf16.xpose.msra.mxu0 %v432_v8 }
  0x4f   :  { %410 = vmatmul.mubr.bf16.vlgmr.msra.gmra.mxu0 %v433_v9 }
 0x10f   :  { %v139_v16 = vpop.f32.mrf.mxu0 }
 0x110   :  { %v146_v17 = vmul.f32 14.285714, %v139_v16 }
 0x111   :  { %v411_v18 = vpop.f32.mrf.mxu0 }
 0x112   :  { %v195_v19 = vsel %vm190_vm4, %v146_v17, -1e+30  ;;  %v201_v38 = vsel %vm193_vm6, %v146_v17, -1e+30 }
 0x113   :  { %197 = vmax.xlane.f32.xlu0 %v195_v19  ;;  %v142_v20 = vpop.f32.mrf.mxu0 }
 0x114   :  { %v147_v21 = vmul.f32 14.285714, %v142_v20 }
 0x115   :  { %v412_v22 = vpop.f32.mrf.mxu0 }
 0x116   :  { %v196_v23 = vsel %vm190_vm4, %v147_v21, -1e+30  ;;  %v202_v42 = vsel %vm194_vm7, %v147_v21, -1e+30 }
 0x117   :  { %199 = vmax.xlane.f32.xlu0 %v196_v23 }
 0x12d   :  { %152 = vperm.xlu0 %424, %v148_v24  }
 0x19c   :  { %v198_v26 = vpop.xlane.xlu0 %197 }
 0x19d   :  { %v263_v27 = vmax.f32 %v261_v25, %v198_v26 }
 0x19f   :  { %v265_v29 = vsub.f32 %v261_v25, %v263_v27  ;;  %312 = vst.msk [vmem:[#allocation2] sm:$0xff] %vm252_vm3, %v263_v27  ;;  %273 = vperm.xlu1 %423, %v263_v27  }
 0x1a0   :  { %v200_v30 = vpop.xlane.xlu0 %199 }
 0x1a1   :  { %v264_v31 = vmax.f32 %v262_v28, %v200_v30  ;;  %v267_v56 = vmul.f32 1.442695, %v265_v29 }
 0x1a3   :  { %v266_v32 = vsub.f32 %v262_v28, %v264_v31  ;;  %313 = vst.msk [vmem:[#allocation2 + $0x8] sm:$0xff] %vm252_vm3, %v264_v31  ;;  %278 = vperm.xlu1 %423, %v264_v31  }
 0x1a5   :  { %v269_v57 = vmul.f32 1.442695, %v266_v32 }
 0x1a6   :  { %v329_v25 = vld [vmem:[#allocation2] sm:$0xff] }
 0x1a7   :  { %155 = vperm.xlu1 %423, %v149_v33  }
 0x1a8   :  { %v153_v35 = vpop.permute.xlu0 %152 }
 0x1a9   :  { %vm161_vm5 = vcmp.eq.s32.totalorder %v153_v35, %v381_v34 }
 0x1aa   :  { %v382_v36 = vsel %vm161_vm5, 1.0, %v497_v0  ;;  %v330_v31 = vld [vmem:[#allocation2 + $0x8] sm:$0xff] }
 0x1ab   :  { %v203_v37 = vsel %vm193_vm6, %v382_v36, 0.0 }
 0x1ac   :  { %v205_v51 = vmul.f32 %v203_v37, %v146_v17 }
 0x1cb   :  { %211 = vadd.xlane.f32.xlu1 %v203_v37 }
 0x21a   :  { %v274_v39 = vpop.permute.xlu1 %273 }
 0x21b   :  { %v281_v40 = vsub.f32 %v201_v38, %v274_v39 }
 0x21d   :  { %v283_v41 = vmul.f32 1.442695, %v281_v40 }
 0x21e   :  { %v279_v43 = vpop.permute.xlu1 %278 }
 0x21f   :  { %434 = vpow2.f32 %v283_v41  ;;  %v282_v44 = vsub.f32 %v202_v42, %v279_v43 }
 0x221   :  { %v285_v45 = vmul.f32 1.442695, %v282_v44 }
 0x222   :  { %v156_v46 = vpop.permute.xlu1 %155 }
 0x223   :  { %436 = vpow2.f32 %v285_v45  ;;  %vm162_vm8 = vcmp.eq.s32.totalorder %v156_v46, %v381_v34 }
 0x224   :  { %v383_v47 = vsel %vm162_vm8, 1.0, %v497_v0  ;;  %438 = vpow2.f32 %v267_v56 }
 0x225   :  { %v204_v48 = vsel %vm194_vm7, %v383_v47, 0.0  ;;  %440 = vpow2.f32 %v269_v57 }
 0x226   :  { %213 = vadd.xlane.f32.xlu1 %v204_v48  ;;  %v206_v52 = vmul.f32 %v204_v48, %v147_v21 }
 0x22c   :  { %v435_v49 = vpop.eup %434 }
 0x22d   :  { %291 = vadd.xlane.f32.xlu0 %v435_v49 }
 0x230   :  { %v437_v50 = vpop.eup %436 }
 0x231   :  { %293 = vadd.xlane.f32.xlu1 %v437_v50  ;;  %v439_v61 = vpop.eup %438 }
 0x232   :  { %v289_v0 = vmul.f32 %v439_v61, %v287_v62  ;;  %v441_v1 = vpop.eup %440 }
 0x233   :  { %v290_v6 = vmul.f32 %v441_v1, %v288_v3 }
 0x235   :  { %207 = vadd.xlane.f32.xlu1 %v205_v51 }
 0x239   :  { %209 = vadd.xlane.f32.xlu1 %v206_v52 }
 0x254   :  { %v212_v54 = vpop.xlane.xlu1 %211 }
 0x255   :  { %v308_v55 = vadd.f32 %v306_v53, %v212_v54 }
 0x257   :  { %310 = vst.msk [vmem:[#allocation5] sm:$0xff] %vm252_vm3, %v308_v55 }
 0x25e   :  { %v317_v63 = vld [vmem:[#allocation5] sm:$0xff] }
 0x25f   :  { %vm319_vm9 = vcmp.gt.f32.partialorder %v317_v63, 0.0 }
 0x260   :  { %v321_v5 = vsel %vm319_vm9, %v317_v63, 1.0 }
 0x261   :  { %442 = vrcp.f32 %v321_v5 }
 0x26e   :  { %v443_v19 = vpop.eup %442 }
 0x2af   :  { %v214_v59 = vpop.xlane.xlu1 %213 }
 0x2b0   :  { %v309_v60 = vadd.f32 %v307_v58, %v214_v59 }
 0x2b2   :  { %311 = vst.msk [vmem:[#allocation5 + $0x8] sm:$0xff] %vm252_vm3, %v309_v60 }
 0x2b6   :  { %v292_v2 = vpop.xlane.xlu0 %291 }
 0x2b7   :  { %v295_v4 = vadd.f32 %v292_v2, %v289_v0 }
 0x2b9   :  { %298 = vst.msk [vmem:[#allocation3] sm:$0xff] %vm252_vm3, %v295_v4  ;;  %v318_v7 = vld [vmem:[#allocation5 + $0x8] sm:$0xff] }
 0x2ba   :  { %v294_v8 = vpop.xlane.xlu1 %293  ;;  %vm320_vm10 = vcmp.gt.f32.partialorder %v318_v7, 0.0 }
 0x2bb   :  { %v296_v9 = vadd.f32 %v294_v8, %v290_v6  ;;  %v322_v11 = vsel %vm320_vm10, %v318_v7, 1.0 }
 0x2bc   :  { %444 = vrcp.f32 %v322_v11 }
 0x2bd   :  { %299 = vst.msk [vmem:[#allocation3 + $0x8] sm:$0xff] %vm252_vm3, %v296_v9 }
 0x2be   :  { %v208_v12 = vpop.xlane.xlu1 %207 }
 0x2bf   :  { %v302_v13 = vadd.f32 %v300_v10, %v208_v12 }
 0x2c0   :  { %v333_v15 = vld [vmem:[#allocation3] sm:$0xff] }
 0x2c1   :  { %304 = vst.msk [vmem:[#allocation4] sm:$0xff] %vm252_vm3, %v302_v13  ;;  %446 = vlog2.f32 %v333_v15 }
 0x2c2   :  { %v210_v16 = vpop.xlane.xlu1 %209 }
 0x2c3   :  { %v303_v17 = vadd.f32 %v301_v14, %v210_v16 }
 0x2c4   :  { %v334_v18 = vld [vmem:[#allocation3 + $0x8] sm:$0xff] }
 0x2c5   :  { %305 = vst.msk [vmem:[#allocation4 + $0x8] sm:$0xff] %vm252_vm3, %v303_v17  ;;  %448 = vlog2.f32 %v334_v18 }
 0x2c8   :  { %v323_v20 = vld [vmem:[#allocation4] sm:$0xff] }
 0x2c9   :  { %v326_v21 = vmul.f32 %v443_v19, %v323_v20  ;;  %v445_v23 = vpop.eup %444 }
 0x2cb   :  { %v331_v26 = vsub.f32 %v326_v21, %v329_v25 }
 0x2cc   :  { %v324_v22 = vld [vmem:[#allocation4 + $0x8] sm:$0xff] }
 0x2cd   :  { %v328_v28 = vmul.f32 %v445_v23, %v324_v22 }
 0x2ce   :  { %v447_v24 = vpop.eup %446 }
 0x2cf   :  { %v336_v27 = vmul.f32 0.6931472, %v447_v24  ;;  %v332_v33 = vsub.f32 %v328_v28, %v330_v31 }
 0x2d1   :  { %v339_v29 = vsub.f32 %v331_v26, %v336_v27 }
 0x2d2   :  { %v449_v30 = vpop.eup %448 }
 0x2d3   :  { %v341_v32 = vmul.f32 -1.0, %v339_v29  ;;  %v338_v34 = vmul.f32 0.6931472, %v449_v30 }
 0x2d5   :  { %345 = vperm.xlu1 %423, %v341_v32   ;;  %v340_v35 = vsub.f32 %v332_v33, %v338_v34 }
 0x2d7   :  { %v342_v36 = vmul.f32 -1.0, %v340_v35 }
 0x2d9   :  { %350 = vperm.xlu1 %423, %v342_v36  }
 0x350   :  { %v346_v37 = vpop.permute.xlu1 %345 }
 0x351   :  { %353 = vst [vmem:[#allocation9] sm:$0xff] %v346_v37 }
 0x354   :  { %v351_v38 = vpop.permute.xlu1 %350 }
 0x355   :  { %354 = vst [vmem:[#allocation9 + $0x8] sm:$0xff] %v351_v38 }
 0x356   :  { %481 = shalt.err (!%p478_p9)
}
 0x357   :  { %s502_s29 = smov 128   ;;  %s503_s30 = smov 8  }
 0x358   :  { %366 = dma.vmem_to_hbm [thread:$0]  %s361_s3, 256, %s590_s4, [#allocation8], %s502_s29, %s502_s29, %s503_s30  }
 0x359   :  { %492 = dma.done.wait [#allocation8], 256  }
 0x35a   :  { %493 = vsyncadd [#allocation8], 4294967040 }
 0x35b   :  { %370 = vsyncpa [#allocation7], 1 }
 0x35c   :  { %371 = vsyncpa [#allocation8], 1 }

</bundles_post_ra>
